<compile_context>
chip_gen: v5e
topology: v5e:2x2
jax: 0.10.0
libtpu: 0.0.40
codegen_flags: <defaults>
</compile_context>

<pallas_src>
import functools

import jax
import jax.numpy as jnp
from jax.experimental import pallas as pl
from jax.experimental.pallas import tpu as pltpu


def _round_up(x, m):
    return ((x + m - 1) // m) * m


def rnn_kernel(emb_ref, wih_ref, bias_ref, whh_ref, wfc_ref, bfc_ref,
               out_ref, h_ref, p_ref, *, seq_len, chunk_t, bp):
    """One grid step = one time chunk of the recurrence.

    Grid: (num_chunks,), axis "arbitrary" (hidden state carried across steps).

    emb_ref : (chunk_t * bp, E)   bf16  embedded chunk (time-major, batch-padded)
    wih_ref : (E, Hp)             bf16  W_ih^T            (zero-padded cols)
    bias_ref: (1, Hp)             f32   b_ih + b_hh fused (zero-padded)
    whh_ref : (Hp, Hp)            f32   W_hh^T            (zero-padded)
    wfc_ref : (Hp, Op)            f32   W_fc^T            (zero-padded)
    bfc_ref : (1, Op)             f32
    out_ref : (bp, Op)            resident output block, written on last chunk
    h_ref   : VMEM scratch (bp, Hp)          carried hidden state
    p_ref   : VMEM scratch (chunk_t*bp, Hp)  per-chunk input projection
    """
    c = pl.program_id(0)
    n_chunks = pl.num_programs(0)

    @pl.when(c == 0)
    def _():
        h_ref[...] = jnp.zeros_like(h_ref)

    # Hoisted input projection for this chunk: one MXU matmul (bf16 operands,
    # f32 accumulate); bias folded in here, off the serial critical path.
    p_ref[...] = (
        jnp.dot(emb_ref[...], wih_ref[...], preferred_element_type=jnp.float32)
        + bias_ref[...]
    )

    mask_needed = (seq_len % chunk_t) != 0  # static

    def step(i, h):
        base = pl.multiple_of(i * bp, bp)          # sublane-aligned window
        p_t = p_ref[pl.ds(base, bp), :]            # (bp, Hp)
        h_new = jnp.tanh(
            p_t + jnp.dot(h, whh_ref[...], preferred_element_type=jnp.float32))
        if mask_needed:
            t = c * chunk_t + i
            h_new = jnp.where(t < seq_len, h_new, h)
        return h_new

    # Bounded unroll: chunk_t <= 8 by construction, so full unroll of the chunk
    # keeps LLO visibility without exploding code size / vreg live ranges.
    h = jax.lax.fori_loop(0, chunk_t, step, h_ref[...], unroll=True)
    h_ref[...] = h

    @pl.when(c == n_chunks - 1)
    def _():
        out_ref[...] = (
            jnp.dot(h, wfc_ref[...], preferred_element_type=jnp.float32)
            + bfc_ref[...]
        ).astype(out_ref.dtype)


def rnn_forward(text, params, *, chunk_t=8):
    """text: (seq_len, batch) int32 token ids."""
    emb, w_ih, w_hh, b_ih, b_hh, w_fc, b_fc = (
        params["embedding"], params["w_ih"], params["w_hh"],
        params["b_ih"], params["b_hh"], params["w_fc"], params["b_fc"],
    )
    seq_len, batch = text.shape
    embedding_dim = emb.shape[1]
    hidden_dim = w_ih.shape[0]
    output_dim = w_fc.shape[0]

    # Pad batch to an f32 sublane multiple, hidden/output to lane multiples.
    bp = max(_round_up(batch, 8), 8)
    hp = max(_round_up(hidden_dim, 128), 128)
    op = max(_round_up(output_dim, 128), 128)

    chunk_t = max(1, min(chunk_t, seq_len))
    n_chunks = pl.cdiv(seq_len, chunk_t)
    seq_pad = n_chunks * chunk_t

    # Embedding lookup (gather) stays in plain JAX glue; all matmuls and the
    # recurrence run inside the Pallas kernel.
    # TODO(synk): fuse the gather into the kernel via PrefetchScalarGridSpec +
    # pl.Element row gather (or gather from a pre-projected (vocab, Hp) table)
    # to avoid materializing the (seq, bp, E) activation slab in HBM.
    embedded = jnp.take(emb, text, axis=0)                          # (seq, batch, E)
    embedded = jnp.pad(
        embedded, ((0, seq_pad - seq_len), (0, bp - batch), (0, 0)))
    emb_flat = embedded.reshape(seq_pad * bp, embedding_dim).astype(jnp.bfloat16)

    # Zero-pad weights to lane-dense shapes and pre-transpose so the kernel
    # computes x @ W directly; fuse the two recurrent biases.
    w_ih_t = jnp.zeros((embedding_dim, hp), jnp.bfloat16
                       ).at[:, :hidden_dim].set(w_ih.T.astype(jnp.bfloat16))
    w_hh_t = jnp.zeros((hp, hp), jnp.float32).at[:hidden_dim, :hidden_dim].set(w_hh.T)
    w_fc_t = jnp.zeros((hp, op), jnp.float32).at[:hidden_dim, :output_dim].set(w_fc.T)
    bias = jnp.zeros((1, hp), jnp.float32).at[0, :hidden_dim].set(b_ih + b_hh)
    b_fc_2d = jnp.zeros((1, op), jnp.float32).at[0, :output_dim].set(b_fc)

    tcb = chunk_t * bp
    # TODO(synk): for batch >= 16 padded rows, add a leading "parallel" batch-tile
    # grid axis (per-tile hidden scratch) to use v7x's second TensorCore.
    out = pl.pallas_call(
        functools.partial(rnn_kernel, seq_len=seq_len, chunk_t=chunk_t, bp=bp),
        out_shape=jax.ShapeDtypeStruct((bp, op), jnp.float32),
        grid=(n_chunks,),
        in_specs=[
            pl.BlockSpec((tcb, embedding_dim), lambda c: (c, 0)),   # streamed chunk
            pl.BlockSpec((embedding_dim, hp), lambda c: (0, 0)),    # resident weights
            pl.BlockSpec((1, hp), lambda c: (0, 0)),
            pl.BlockSpec((hp, hp), lambda c: (0, 0)),
            pl.BlockSpec((hp, op), lambda c: (0, 0)),
            pl.BlockSpec((1, op), lambda c: (0, 0)),
        ],
        out_specs=pl.BlockSpec((bp, op), lambda c: (0, 0)),
        scratch_shapes=[
            pltpu.VMEM((bp, hp), jnp.float32),    # carried hidden state
            pltpu.VMEM((tcb, hp), jnp.float32),   # per-chunk projection
        ],
        compiler_params=pltpu.CompilerParams(
            dimension_semantics=("arbitrary",),   # recurrence: sequential axis
            vmem_limit_bytes=32 * 1024 * 1024,    # explicit; valid on v5e/v6e/v7x
        ),
    )(emb_flat, w_ih_t, bias, w_hh_t, w_fc_t, b_fc_2d)

    return out[:batch, :output_dim]


def init_params(key, input_dim, embedding_dim, hidden_dim, output_dim):
    ks = jax.random.split(key, 7)
    s_rnn = 1.0 / jnp.sqrt(hidden_dim)
    s_fc = 1.0 / jnp.sqrt(hidden_dim)
    return {
        "embedding": jax.random.normal(ks[0], (input_dim, embedding_dim), jnp.float32),
        "w_ih": jax.random.uniform(ks[1], (hidden_dim, embedding_dim), jnp.float32, -s_rnn, s_rnn),
        "w_hh": jax.random.uniform(ks[2], (hidden_dim, hidden_dim), jnp.float32, -s_rnn, s_rnn),
        "b_ih": jax.random.uniform(ks[3], (hidden_dim,), jnp.float32, -s_rnn, s_rnn),
        "b_hh": jax.random.uniform(ks[4], (hidden_dim,), jnp.float32, -s_rnn, s_rnn),
        "w_fc": jax.random.uniform(ks[5], (output_dim, hidden_dim), jnp.float32, -s_fc, s_fc),
        "b_fc": jax.random.uniform(ks[6], (output_dim,), jnp.float32, -s_fc, s_fc),
    }


def rnn_forward_ref(text, params):
    """Pure-JAX reference matching PyTorch nn.Embedding + nn.RNN + nn.Linear."""
    emb = jnp.take(params["embedding"], text, axis=0)  # (seq, batch, E)
    batch = text.shape[1]
    hidden_dim = params["w_ih"].shape[0]
    h = jnp.zeros((batch, hidden_dim), jnp.float32)

    def step(h, x_t):
        h_new = jnp.tanh(x_t @ params["w_ih"].T + params["b_ih"]
                         + h @ params["w_hh"].T + params["b_hh"])
        return h_new, None

    h_final, _ = jax.lax.scan(step, h, emb)
    return h_final @ params["w_fc"].T + params["b_fc"]


if __name__ == "__main__":
    input_dim = 50       # vocab size
    embedding_dim = 16
    hidden_dim = 32
    output_dim = 4
    seq_len = 8
    batch = 2

    key = jax.random.PRNGKey(0)
    k_params, k_text = jax.random.split(key)
    params = init_params(k_params, input_dim, embedding_dim, hidden_dim, output_dim)
    text = jax.random.randint(k_text, (seq_len, batch), 0, input_dim, dtype=jnp.int32)

    # chunk_t=4 -> 2 time chunks, exercising the carried-hidden-state grid path.
    out = rnn_forward(text, params, chunk_t=4)
    out = jax.block_until_ready(out)

    ref = rnn_forward_ref(text, params)
    assert out.shape == (batch, output_dim)
    # bf16 MXU operands on the input projection -> loosened tolerance vs f32 ref.
    assert jnp.allclose(out, ref, atol=2e-2, rtol=2e-2), "mismatch vs reference"

    print("KERNEL_OK")
</pallas_src>

<mosaic_0001>
module attributes {stable_mosaic.version = 11 : i64} {
  func.func @rnn_kernel(%arg0: i32, %arg1: memref<32x16xbf16, #tpu.memory_space<vmem>>, %arg2: memref<16x128xbf16, #tpu.memory_space<vmem>>, %arg3: memref<1x128xf32, #tpu.memory_space<vmem>>, %arg4: memref<128x128xf32, #tpu.memory_space<vmem>>, %arg5: memref<128x128xf32, #tpu.memory_space<vmem>>, %arg6: memref<1x128xf32, #tpu.memory_space<vmem>>, %arg7: memref<8x128xf32, #tpu.memory_space<vmem>>, %arg8: memref<8x128xf32, #tpu.memory_space<vmem>>, %arg9: memref<32x128xf32, #tpu.memory_space<vmem>>) attributes {dimension_semantics = [#tpu.dimension_semantics<arbitrary>], iteration_bounds = array<i64: 2>, scalar_prefetch = 0 : i64, scratch_operands = 2 : i64, tpu.core_type = #tpu.core_type<tc>, window_params = [{transform_indices = @transform_0, window_bounds = array<i64: 32, 16>}, {pipeline_mode = #tpu.pipeline_mode<synchronous>, transform_indices = @transform_1, window_bounds = array<i64: 16, 128>}, {pipeline_mode = #tpu.pipeline_mode<synchronous>, transform_indices = @transform_2, window_bounds = array<i64: 1, 128>}, {pipeline_mode = #tpu.pipeline_mode<synchronous>, transform_indices = @transform_3, window_bounds = array<i64: 128, 128>}, {pipeline_mode = #tpu.pipeline_mode<synchronous>, transform_indices = @transform_4, window_bounds = array<i64: 128, 128>}, {pipeline_mode = #tpu.pipeline_mode<synchronous>, transform_indices = @transform_5, window_bounds = array<i64: 1, 128>}, {pipeline_mode = #tpu.pipeline_mode<synchronous>, transform_indices = @transform_6, window_bounds = array<i64: 8, 128>}]} {
    %c0_i32 = arith.constant 0 : i32
    %0 = arith.cmpi eq, %arg0, %c0_i32 : i32
    %1 = arith.extui %0 : i1 to i32
    %c0_i32_0 = arith.constant 0 : i32
    %2 = arith.cmpi ne, %1, %c0_i32_0 : i32
    scf.if %2 {
      %cst_34 = arith.constant 0.000000e+00 : f32
      %47 = vector.broadcast %cst_34 : f32 to vector<8x128xf32>
      %c0_35 = arith.constant 0 : index
      %c0_36 = arith.constant 0 : index
      %48 = vector.load %arg8[%c0_35, %c0_36] : memref<8x128xf32, #tpu.memory_space<vmem>>, vector<8x128xf32>
      tpu.vector_store %arg8[%c0_35, %c0_36], %47 {strides = array<i32>} : memref<8x128xf32, #tpu.memory_space<vmem>>, vector<8x128xf32>,
    } else {
    }
    %c0 = arith.constant 0 : index
    %c0_1 = arith.constant 0 : index
    %3 = vector.load %arg1[%c0, %c0_1] : memref<32x16xbf16, #tpu.memory_space<vmem>>, vector<32x16xbf16>
    %c0_2 = arith.constant 0 : index
    %c0_3 = arith.constant 0 : index
    %4 = vector.load %arg2[%c0_2, %c0_3] : memref<16x128xbf16, #tpu.memory_space<vmem>>, vector<16x128xbf16>
    %cst = arith.constant dense<0.000000e+00> : vector<32x128xf32>
    %5 = tpu.matmul %3, %4, %cst {dimension_numbers = #tpu.dot_dimension_numbers<[1], [0], [0], [1], [0, 0, 1, 1], [], []>} : vector<32x16xbf16>, vector<16x128xbf16>, vector<32x128xf32> -> vector<32x128xf32>
    %c0_4 = arith.constant 0 : index
    %c0_5 = arith.constant 0 : index
    %6 = vector.load %arg3[%c0_4, %c0_5] : memref<1x128xf32, #tpu.memory_space<vmem>>, vector<1x128xf32>
    %7 = vector.broadcast %6 : vector<1x128xf32> to vector<32x128xf32>
    %8 = arith.addf %5, %7 : vector<32x128xf32>
    %c0_6 = arith.constant 0 : index
    %c0_7 = arith.constant 0 : index
    %9 = vector.load %arg9[%c0_6, %c0_7] : memref<32x128xf32, #tpu.memory_space<vmem>>, vector<32x128xf32>
    tpu.vector_store %arg9[%c0_6, %c0_7], %8 {strides = array<i32>} : memref<32x128xf32, #tpu.memory_space<vmem>>, vector<32x128xf32>,
    %c0_8 = arith.constant 0 : index
    %c0_9 = arith.constant 0 : index
    %10 = vector.load %arg8[%c0_8, %c0_9] : memref<8x128xf32, #tpu.memory_space<vmem>>, vector<8x128xf32>
    %c0_i32_10 = arith.constant 0 : i32
    %c8_i32 = arith.constant 8 : i32
    %11 = arith.muli %c0_i32_10, %c8_i32 : i32
    %12 = tpu.assume_multiple %11, 8 : i32
    %13 = arith.index_cast %12 : i32 to index
    %c0_11 = arith.constant 0 : index
    %14 = vector.load %arg9[%13, %c0_11] : memref<32x128xf32, #tpu.memory_space<vmem>>, vector<8x128xf32>
    %c0_12 = arith.constant 0 : index
    %c0_13 = arith.constant 0 : index
    %15 = vector.load %arg4[%c0_12, %c0_13] : memref<128x128xf32, #tpu.memory_space<vmem>>, vector<128x128xf32>
    %cst_14 = arith.constant dense<0.000000e+00> : vector<8x128xf32>
    %16 = tpu.matmul %10, %15, %cst_14 {dimension_numbers = #tpu.dot_dimension_numbers<[1], [0], [0], [1], [0, 0, 1, 1], [], []>} : vector<8x128xf32>, vector<128x128xf32>, vector<8x128xf32> -> vector<8x128xf32>
    %17 = arith.addf %14, %16 : vector<8x128xf32>
    %18 = math.tanh %17 : vector<8x128xf32>
    %c1_i32 = arith.constant 1 : i32
    %c8_i32_15 = arith.constant 8 : i32
    %19 = arith.muli %c1_i32, %c8_i32_15 : i32
    %20 = tpu.assume_multiple %19, 8 : i32
    %21 = arith.index_cast %20 : i32 to index
    %c0_16 = arith.constant 0 : index
    %22 = vector.load %arg9[%21, %c0_16] : memref<32x128xf32, #tpu.memory_space<vmem>>, vector<8x128xf32>
    %c0_17 = arith.constant 0 : index
    %c0_18 = arith.constant 0 : index
    %23 = vector.load %arg4[%c0_17, %c0_18] : memref<128x128xf32, #tpu.memory_space<vmem>>, vector<128x128xf32>
    %cst_19 = arith.constant dense<0.000000e+00> : vector<8x128xf32>
    %24 = tpu.matmul %18, %23, %cst_19 {dimension_numbers = #tpu.dot_dimension_numbers<[1], [0], [0], [1], [0, 0, 1, 1], [], []>} : vector<8x128xf32>, vector<128x128xf32>, vector<8x128xf32> -> vector<8x128xf32>
    %25 = arith.addf %22, %24 : vector<8x128xf32>
    %26 = math.tanh %25 : vector<8x128xf32>
    %c2_i32 = arith.constant 2 : i32
    %c8_i32_20 = arith.constant 8 : i32
    %27 = arith.muli %c2_i32, %c8_i32_20 : i32
    %28 = tpu.assume_multiple %27, 8 : i32
    %29 = arith.index_cast %28 : i32 to index
    %c0_21 = arith.constant 0 : index
    %30 = vector.load %arg9[%29, %c0_21] : memref<32x128xf32, #tpu.memory_space<vmem>>, vector<8x128xf32>
    %c0_22 = arith.constant 0 : index
    %c0_23 = arith.constant 0 : index
    %31 = vector.load %arg4[%c0_22, %c0_23] : memref<128x128xf32, #tpu.memory_space<vmem>>, vector<128x128xf32>
    %cst_24 = arith.constant dense<0.000000e+00> : vector<8x128xf32>
    %32 = tpu.matmul %26, %31, %cst_24 {dimension_numbers = #tpu.dot_dimension_numbers<[1], [0], [0], [1], [0, 0, 1, 1], [], []>} : vector<8x128xf32>, vector<128x128xf32>, vector<8x128xf32> -> vector<8x128xf32>
    %33 = arith.addf %30, %32 : vector<8x128xf32>
    %34 = math.tanh %33 : vector<8x128xf32>
    %c3_i32 = arith.constant 3 : i32
    %c8_i32_25 = arith.constant 8 : i32
    %35 = arith.muli %c3_i32, %c8_i32_25 : i32
    %36 = tpu.assume_multiple %35, 8 : i32
    %37 = arith.index_cast %36 : i32 to index
    %c0_26 = arith.constant 0 : index
    %38 = vector.load %arg9[%37, %c0_26] : memref<32x128xf32, #tpu.memory_space<vmem>>, vector<8x128xf32>
    %c0_27 = arith.constant 0 : index
    %c0_28 = arith.constant 0 : index
    %39 = vector.load %arg4[%c0_27, %c0_28] : memref<128x128xf32, #tpu.memory_space<vmem>>, vector<128x128xf32>
    %cst_29 = arith.constant dense<0.000000e+00> : vector<8x128xf32>
    %40 = tpu.matmul %34, %39, %cst_29 {dimension_numbers = #tpu.dot_dimension_numbers<[1], [0], [0], [1], [0, 0, 1, 1], [], []>} : vector<8x128xf32>, vector<128x128xf32>, vector<8x128xf32> -> vector<8x128xf32>
    %41 = arith.addf %38, %40 : vector<8x128xf32>
    %42 = math.tanh %41 : vector<8x128xf32>
    %c4_i32 = arith.constant 4 : i32
    %c0_30 = arith.constant 0 : index
    %c0_31 = arith.constant 0 : index
    %43 = vector.load %arg8[%c0_30, %c0_31] : memref<8x128xf32, #tpu.memory_space<vmem>>, vector<8x128xf32>
    tpu.vector_store %arg8[%c0_30, %c0_31], %42 {strides = array<i32>} : memref<8x128xf32, #tpu.memory_space<vmem>>, vector<8x128xf32>,
    %c1_i32_32 = arith.constant 1 : i32
    %44 = arith.cmpi eq, %arg0, %c1_i32_32 : i32
    %45 = arith.extui %44 : i1 to i32
    %c0_i32_33 = arith.constant 0 : i32
    %46 = arith.cmpi ne, %45, %c0_i32_33 : i32
    scf.if %46 {
      %c0_34 = arith.constant 0 : index
      %c0_35 = arith.constant 0 : index
      %47 = vector.load %arg5[%c0_34, %c0_35] : memref<128x128xf32, #tpu.memory_space<vmem>>, vector<128x128xf32>
      %cst_36 = arith.constant dense<0.000000e+00> : vector<8x128xf32>
      %48 = tpu.matmul %42, %47, %cst_36 {dimension_numbers = #tpu.dot_dimension_numbers<[1], [0], [0], [1], [0, 0, 1, 1], [], []>} : vector<8x128xf32>, vector<128x128xf32>, vector<8x128xf32> -> vector<8x128xf32>
      %c0_37 = arith.constant 0 : index
      %c0_38 = arith.constant 0 : index
      %49 = vector.load %arg6[%c0_37, %c0_38] : memref<1x128xf32, #tpu.memory_space<vmem>>, vector<1x128xf32>
      %50 = vector.broadcast %49 : vector<1x128xf32> to vector<8x128xf32>
      %51 = arith.addf %48, %50 : vector<8x128xf32>
      %c0_39 = arith.constant 0 : index
      %c0_40 = arith.constant 0 : index
      %52 = vector.load %arg7[%c0_39, %c0_40] : memref<8x128xf32, #tpu.memory_space<vmem>>, vector<8x128xf32>
      tpu.vector_store %arg7[%c0_39, %c0_40], %51 {strides = array<i32>} : memref<8x128xf32, #tpu.memory_space<vmem>>, vector<8x128xf32>,
    } else {
    }
    return
  }
  func.func @transform_0(%arg0: i32) -> (i32, i32) {
    %c0_i32 = arith.constant 0 : i32
    %c0_i32_0 = arith.constant 0 : i32
    return %arg0, %c0_i32 : i32, i32
  }
  func.func @transform_1(%arg0: i32) -> (i32, i32) {
    %c0_i32 = arith.constant 0 : i32
    %c0_i32_0 = arith.constant 0 : i32
    %c0_i32_1 = arith.constant 0 : i32
    return %c0_i32, %c0_i32_0 : i32, i32
  }
  func.func @transform_2(%arg0: i32) -> (i32, i32) {
    %c0_i32 = arith.constant 0 : i32
    %c0_i32_0 = arith.constant 0 : i32
    %c0_i32_1 = arith.constant 0 : i32
    return %c0_i32, %c0_i32_0 : i32, i32
  }
  func.func @transform_3(%arg0: i32) -> (i32, i32) {
    %c0_i32 = arith.constant 0 : i32
    %c0_i32_0 = arith.constant 0 : i32
    %c0_i32_1 = arith.constant 0 : i32
    return %c0_i32, %c0_i32_0 : i32, i32
  }
  func.func @transform_4(%arg0: i32) -> (i32, i32) {
    %c0_i32 = arith.constant 0 : i32
    %c0_i32_0 = arith.constant 0 : i32
    %c0_i32_1 = arith.constant 0 : i32
    return %c0_i32, %c0_i32_0 : i32, i32
  }
  func.func @transform_5(%arg0: i32) -> (i32, i32) {
    %c0_i32 = arith.constant 0 : i32
    %c0_i32_0 = arith.constant 0 : i32
    %c0_i32_1 = arith.constant 0 : i32
    return %c0_i32, %c0_i32_0 : i32, i32
  }
  func.func @transform_6(%arg0: i32) -> (i32, i32) {
    %c0_i32 = arith.constant 0 : i32
    %c0_i32_0 = arith.constant 0 : i32
    %c0_i32_1 = arith.constant 0 : i32
    return %c0_i32, %c0_i32_0 : i32, i32
  }
}

</mosaic_0001>

<bundles_post_ra>
// kernel: tpu_custom_call.1
= control target key start
LH: loop header
LB: loop body
LE: loop exit
PB: predicated region body
PF: predicated region fallthrough
CT: control target
= control target key end

     0   :  { %11 = vsyncpa [#allocation5], 0  ;;  %s860_s0 = inlined_call_operand.vmem [shape: bf16[64,16], index: 0, kind: input, shape index: {}]   ;;  %s861_s1 = inlined_call_operand.vmem [shape: bf16[16,128], index: 1, kind: input, shape index: {}]   ;;  %s862_s2 = inlined_call_operand.vmem [shape: f32[1,128], index: 2, kind: input, shape index: {}]   ;;  %s863_s3 = inlined_call_operand.hbm [shape: f32[128,128], index: 3, kind: input, shape index: {}]   ;;  %s864_s4 = inlined_call_operand.hbm [shape: f32[128,128], index: 4, kind: input, shape index: {}]   ;;  %s865_s5 = inlined_call_operand.vmem [shape: f32[1,128], index: 5, kind: input, shape index: {}]   ;;  %s866_s6 = inlined_call_operand.hbm [shape: f32[8,128], index: 6, kind: output, shape index: {}]  }
   0x1   :  { %12 = vsyncpa [#allocation8], 0 }
   0x2   :  { %13 = vsyncpa [#allocation6], 0  ;;  %s795_s21 = smov 0  }
   0x3 LB: > { %s193_s24 = sshll.u32 %s863_s3, 4  ;;  %s804_s25 = sadd.s32 4294967295, %s752_s21   ;;  %s752_s21 = sphi %s795_s21, %s19_s21   ;;  %s194_s24 = int_to_ptr.hbm [resolvable:$true] %s193_s24 }
   0x4   : > { %p565_p0 = scmp.ge.s32.totalorder %s752_s21, 1  ;;  %p176_p1 = scmp.lt.s32.totalorder %s752_s21, 3 }
   0x5   : > { %p566_p2 = scmp.ne.s32.totalorder %s804_s25, 0  ;;  %p616_p3 = scmp.eq.s32.totalorder %s804_s25, 0 }
   0x6   : > { %p810_p4 = pnand %p565_p0, %p176_p1  ;;  %s754_s27 = smov [#allocation4]  }
   0x7   : > { %s195_s28 = sshll.u32 %s754_s27, 4  ;;  %s207_s7 = sshll.u32 %s864_s4, 4  ;;  %s196_s28 = int_to_ptr.vmem [resolvable:$true] %s195_s28  ;;  %s208_s7 = int_to_ptr.hbm [resolvable:$true] %s207_s7 }
   0x8   : > { %p609_p5 = pneg %p810_p4  ;;  %s755_s8 = smov [#allocation7]  }
   0x9   : > { %s209_s9 = sshll.u32 %s755_s8, 4  ;;  %s756_s10 = smov 128   ;;  %s210_s9 = int_to_ptr.vmem [resolvable:$true] %s209_s9 }
   0xa   : > { %p610_p6 = pnand %p616_p3, %p609_p5  ;;  %s757_s11 = smov 8  }
   0xb   : > { %237 = sbr.rel (%p810_p4) target bundleno = 778 (0x30a), region = 44 }
   0xc   : > { %612 = dma.hbm_to_vmem [thread:$0]  (!%p610_p6), %s194_s24, 2048, %s196_s28, [#allocation5], %s756_s10, %s756_s10, %s757_s11  }
   0xd   : > { %615 = dma.hbm_to_vmem [thread:$0]  (!%p610_p6), %s208_s7, 2048, %s210_s9, [#allocation8], %s756_s10, %s756_s10, %s757_s11  }
  0x10   : > { %739 = dma.done.wait (%p616_p3), [#allocation5], 2048  }
  0x11   : > { %741 = vsyncadd (%p616_p3), [#allocation5], 4294965248 }
  0x12   : > { %743 = dma.done.wait (%p616_p3), [#allocation8], 2048  }
  0x13   : > { %745 = vsyncadd (%p616_p3), [#allocation8], 4294965248  ;;  %s572_s12 = sshll.u32 %s804_s25, 2 }
  0x14   : > { %p269_p7 = scmp.lt.s32.totalorder %s572_s12, 7  ;;  %278 = sbr.rel (%p566_p2) target bundleno = 27 (0x1b), region = 56 }
  0x16   : > { %s869_s12 = smov (!%p269_p7, %s572_s12), 7 }
  0x17   : > { %s573_s13 = sshll.u32 %s869_s12, 2 }
  0x18   : > { %s835_s16 = scalar_lea.vmem %s860_s0, %s573_s13 }
  0x19   : > { %v758_v0 = vmov 0.0  }
  0x1a   : > { %279 = vst [vmem:[#allocation2] sm:$0xff] %v758_v0 }
  0x1b PF: > { %v353_v1 = vld [vmem:[#allocation4 + $0x78] sm:$0xff]  ;;  %v352_v2 = vld [vmem:[#allocation4 + $0x70] sm:$0xff]  ;;  %v351_v3 = vld [vmem:[#allocation4 + $0x68] sm:$0xff]  ;;  %vm306_vm0 = vcmask 130048   ;;  %p589_p8 = scmp.ne.s32.totalorder %s804_s25, 1 }
  0x1c   : > { %354 = vmatpush.msra.mxu1 %v353_v1  ;;  %378 = vmatpush.msra.mxu2 %v353_v1  ;;  %v596_v4 = vld [vmem:[%s861_s1] sm:$0xff]  ;;  %v350_v5 = vld [vmem:[#allocation4 + $0x60] sm:$0xff]  ;;  %v348_v8 = vld [vmem:[#allocation4 + $0x50] sm:$0xff] }
  0x1d   : > { %402 = vmatpush.msra.mxu3 %v353_v1  ;;  %v594_v6 = vld [vmem:[%s835_s16] sm:$0xff]  ;;  %320 = vmatpush.bf16.msra.mxu0 %v596_v4  ;;  %v347_v9 = vld [vmem:[#allocation4 + $0x48] sm:$0xff]  ;;  %v346_v10 = vld [vmem:[#allocation4 + $0x40] sm:$0xff] }
  0x1e   : > { %355 = vmatpush.msra.mxu1 %v352_v2  ;;  %379 = vmatpush.msra.mxu2 %v352_v2  ;;  %v349_v7 = vld [vmem:[#allocation4 + $0x58] sm:$0xff]  ;;  %v344_v12 = vld [vmem:[#allocation4 + $0x30] sm:$0xff]  ;;  %v343_v13 = vld [vmem:[#allocation4 + $0x28] sm:$0xff] }
  0x1f   : > { %403 = vmatpush.msra.mxu3 %v352_v2  ;;  %v345_v11 = vld [vmem:[#allocation4 + $0x38] sm:$0xff]  ;;  %v342_v14 = vld [vmem:[#allocation4 + $0x20] sm:$0xff]  ;;  %v340_v16 = vld [vmem:[#allocation4 + $0x10] sm:$0xff] }
  0x20   : > { %356 = vmatpush.msra.mxu1 %v351_v3  ;;  %380 = vmatpush.msra.mxu2 %v351_v3  ;;  %v341_v15 = vld [vmem:[#allocation4 + $0x18] sm:$0xff]  ;;  %v339_v17 = vld [vmem:[#allocation4 + $0x8] sm:$0xff]  ;;  %v338_v18 = vld [vmem:[#allocation4] sm:$0xff] }
  0x21   : > { %404 = vmatpush.msra.mxu3 %v351_v3  ;;  %426 = vmatpush.msrb.mxu0 %v353_v1  ;;  %v336_v19 = vld [vmem:[#allocation2] sm:$0xff]  ;;  %v595_v26 = vld [vmem:[%s835_s16 + $0x8] sm:$0xff] }
  0x22   : > { %357 = vmatpush.msra.mxu1 %v350_v5  ;;  %587 = vmatmul.msk.bf16.vlgmr.msra.gmra.mxu0 %vm306_vm0, %v594_v6  ;;  %v636_v20 = vld [vmem:[%s862_s2] ss:$0 sm:$0xff] }
  0x23   : > { %381 = vmatpush.msra.mxu2 %v350_v5  ;;  %405 = vmatpush.msra.mxu3 %v350_v5 }
  0x24   : > { %358 = vmatpush.msra.mxu1 %v349_v7  ;;  %427 = vmatpush.msrb.mxu0 %v352_v2 }
  0x25   : > { %382 = vmatpush.msra.mxu2 %v349_v7  ;;  %406 = vmatpush.msra.mxu3 %v349_v7 }
  0x26   : > { %359 = vmatpush.msra.mxu1 %v348_v8  ;;  %428 = vmatpush.msrb.mxu0 %v351_v3 }
  0x27   : > { %383 = vmatpush.msra.mxu2 %v348_v8  ;;  %407 = vmatpush.msra.mxu3 %v348_v8 }
  0x28   : > { %360 = vmatpush.msra.mxu1 %v347_v9  ;;  %429 = vmatpush.msrb.mxu0 %v350_v5 }
  0x29   : > { %384 = vmatpush.msra.mxu2 %v347_v9  ;;  %408 = vmatpush.msra.mxu3 %v347_v9 }
  0x2a   : > { %361 = vmatpush.msra.mxu1 %v346_v10  ;;  %430 = vmatpush.msrb.mxu0 %v349_v7 }
  0x2b   : > { %385 = vmatpush.msra.mxu2 %v346_v10  ;;  %409 = vmatpush.msra.mxu3 %v346_v10 }
  0x2c   : > { %362 = vmatpush.msra.mxu1 %v345_v11  ;;  %431 = vmatpush.msrb.mxu0 %v348_v8 }
  0x2d   : > { %386 = vmatpush.msra.mxu2 %v345_v11  ;;  %410 = vmatpush.msra.mxu3 %v345_v11 }
  0x2e   : > { %363 = vmatpush.msra.mxu1 %v344_v12  ;;  %432 = vmatpush.msrb.mxu0 %v347_v9 }
  0x2f   : > { %387 = vmatpush.msra.mxu2 %v344_v12  ;;  %411 = vmatpush.msra.mxu3 %v344_v12 }
  0x30   : > { %364 = vmatpush.msra.mxu1 %v343_v13  ;;  %433 = vmatpush.msrb.mxu0 %v346_v10 }
  0x31   : > { %388 = vmatpush.msra.mxu2 %v343_v13  ;;  %412 = vmatpush.msra.mxu3 %v343_v13 }
  0x32   : > { %365 = vmatpush.msra.mxu1 %v342_v14  ;;  %434 = vmatpush.msrb.mxu0 %v345_v11 }
  0x33   : > { %389 = vmatpush.msra.mxu2 %v342_v14  ;;  %413 = vmatpush.msra.mxu3 %v342_v14 }
  0x34   : > { %366 = vmatpush.msra.mxu1 %v341_v15  ;;  %435 = vmatpush.msrb.mxu0 %v344_v12 }
  0x35   : > { %390 = vmatpush.msra.mxu2 %v341_v15  ;;  %414 = vmatpush.msra.mxu3 %v341_v15 }
  0x36   : > { %367 = vmatpush.msra.mxu1 %v340_v16  ;;  %436 = vmatpush.msrb.mxu0 %v343_v13 }
  0x37   : > { %391 = vmatpush.msra.mxu2 %v340_v16  ;;  %415 = vmatpush.msra.mxu3 %v340_v16 }
  0x38   : > { %368 = vmatpush.msra.mxu1 %v339_v17  ;;  %437 = vmatpush.msrb.mxu0 %v342_v14 }
  0x39   : > { %392 = vmatpush.msra.mxu2 %v339_v17  ;;  %416 = vmatpush.msra.mxu3 %v339_v17 }
  0x3a   : > { %369 = vmatpush.msra.mxu1 %v338_v18  ;;  %438 = vmatpush.msrb.mxu0 %v341_v15 }
  0x3b   : > { %370 = vmatmul.f32.vlgmr.msra.gmra.mxu1 %v336_v19  ;;  %393 = vmatpush.msra.mxu2 %v338_v18 }
  0x3c   : > { %417 = vmatpush.msra.mxu3 %v338_v18  ;;  %439 = vmatpush.msrb.mxu0 %v340_v16 }
  0x3d   : > { %588 = vmatmul.msk.bf16.gmra.mxu0 %vm306_vm0, %v595_v26 }
  0x3e   : > { %440 = vmatpush.msrb.mxu0 %v339_v17 }
  0x40   : > { %441 = vmatpush.msrb.mxu0 %v338_v18 }
  0x9f   : > { %v322_v21 = vpop.f32.mrf.mxu0 }
  0xa0   : > { %v323_v22 = vadd.f32 %v636_v20, %v322_v21 }
  0xa7   : > { %v324_v27 = vpop.f32.mrf.mxu0 }
  0xa8   : > { %v325_v28 = vadd.f32 %v636_v20, %v324_v27 }
  0xb8   : > { %v371_v23 = vpop.f32.mrf.mxu1 }
  0xb9   : > { %v374_v24 = vadd.f32 %v371_v23, %v323_v22 }
  0xba   : > { %v327_v32 = vpop.f32.mrf.mxu0 }
  0xbb   : > { %637 = vtanh.f32 %v374_v24  ;;  %v328_v33 = vadd.f32 %v636_v20, %v327_v32 }
  0xc1   : > { %v638_v25 = vpop.eup %637 }
  0xc2   : > { %394 = vmatmul.f32.vlgmr.msra.gmra.mxu2 %v638_v25  ;;  %v329_v37 = vpop.f32.mrf.mxu0 }
  0xc3   : > { %v330_v38 = vadd.f32 %v636_v20, %v329_v37 }
 0x145   : > { %v395_v29 = vpop.f32.mrf.mxu2 }
 0x146   : > { %v398_v30 = vadd.f32 %v395_v29, %v325_v28 }
 0x148   : > { %639 = vtanh.f32 %v398_v30 }
 0x14e   : > { %v640_v31 = vpop.eup %639 }
 0x14f   : > { %418 = vmatmul.f32.vlgmr.msra.gmra.mxu3 %v640_v31 }
 0x1d2   : > { %v419_v34 = vpop.f32.mrf.mxu3 }
 0x1d3   : > { %v422_v35 = vadd.f32 %v419_v34, %v328_v33 }
 0x1d5   : > { %641 = vtanh.f32 %v422_v35 }
 0x1db   : > { %v642_v36 = vpop.eup %641 }
 0x1dc   : > { %442 = vmatmul.f32.vlgmr.msrb.gmra.mxu0 %v642_v36 }
 0x259   : > { %v443_v39 = vpop.f32.mrf.mxu0 }
 0x25a   : > { %v446_v40 = vadd.f32 %v443_v39, %v330_v38 }
 0x25c   : > { %643 = vtanh.f32 %v446_v40 }
 0x25f   : > { %452 = sbr.rel (%p589_p8) target bundleno = 773 (0x305), region = 60 }
 0x262   : > { %v644_v41 = vpop.eup %643 }
 0x263   : > { %448 = vst [vmem:[#allocation2] sm:$0xff] %v644_v41 }
 0x264   : > { %v468_v42 = vld [vmem:[#allocation7 + $0x78] sm:$0xff]  ;;  %v467_v43 = vld [vmem:[#allocation7 + $0x70] sm:$0xff]  ;;  %v466_v44 = vld [vmem:[#allocation7 + $0x68] sm:$0xff] }
 0x265   : > { %473 = vmatpush.msra.mxu0 %v468_v42  ;;  %v465_v45 = vld [vmem:[#allocation7 + $0x60] sm:$0xff]  ;;  %v464_v46 = vld [vmem:[#allocation7 + $0x58] sm:$0xff]  ;;  %v463_v47 = vld [vmem:[#allocation7 + $0x50] sm:$0xff] }
 0x266   : > { %v462_v48 = vld [vmem:[#allocation7 + $0x48] sm:$0xff]  ;;  %v461_v49 = vld [vmem:[#allocation7 + $0x40] sm:$0xff]  ;;  %v460_v50 = vld [vmem:[#allocation7 + $0x38] sm:$0xff] }
 0x267   : > { %474 = vmatpush.msra.mxu0 %v467_v43  ;;  %v459_v51 = vld [vmem:[#allocation7 + $0x30] sm:$0xff]  ;;  %v458_v52 = vld [vmem:[#allocation7 + $0x28] sm:$0xff]  ;;  %v457_v53 = vld [vmem:[#allocation7 + $0x20] sm:$0xff] }
 0x268   : > { %v456_v54 = vld [vmem:[#allocation7 + $0x18] sm:$0xff]  ;;  %v455_v55 = vld [vmem:[#allocation7 + $0x10] sm:$0xff]  ;;  %v454_v56 = vld [vmem:[#allocation7 + $0x8] sm:$0xff] }
 0x269   : > { %475 = vmatpush.msra.mxu0 %v466_v44  ;;  %v453_v57 = vld [vmem:[#allocation7] sm:$0xff]  ;;  %v645_v58 = vld [vmem:[%s865_s5] ss:$0 sm:$0xff] }
 0x26b   : > { %476 = vmatpush.msra.mxu0 %v465_v45 }
 0x26d   : > { %477 = vmatpush.msra.mxu0 %v464_v46 }
 0x26f   : > { %478 = vmatpush.msra.mxu0 %v463_v47 }
 0x271   : > { %479 = vmatpush.msra.mxu0 %v462_v48 }
 0x273   : > { %480 = vmatpush.msra.mxu0 %v461_v49 }
 0x275   : > { %481 = vmatpush.msra.mxu0 %v460_v50 }
 0x277   : > { %482 = vmatpush.msra.mxu0 %v459_v51 }
 0x279   : > { %483 = vmatpush.msra.mxu0 %v458_v52 }
 0x27b   : > { %484 = vmatpush.msra.mxu0 %v457_v53 }
 0x27d   : > { %485 = vmatpush.msra.mxu0 %v456_v54 }
 0x27f   : > { %486 = vmatpush.msra.mxu0 %v455_v55 }
 0x281   : > { %487 = vmatpush.msra.mxu0 %v454_v56 }
 0x283   : > { %488 = vmatpush.msra.mxu0 %v453_v57 }
 0x284   : > { %489 = vmatmul.f32.vlgmr.msra.gmra.mxu0 %v644_v41 }
 0x301   : > { %v490_v59 = vpop.f32.mrf.mxu0 }
 0x302   : > { %v491_v60 = vadd.f32 %v645_v58, %v490_v59 }
 0x304   : > { %493 = vst [vmem:[#allocation9] sm:$0xff] %v491_v60 }
 0x305 PF: > { %p620_p9 = scmp.eq.s32.totalorder %s804_s25, 1  ;;  %s759_s24 = smov [#allocation9]  }
 0x306   : > { %s500_s26 = sshll.u32 %s759_s24, 4  ;;  %s502_s29 = sshll.u32 %s866_s6, 4  ;;  %s501_s26 = int_to_ptr.vmem [resolvable:$true] %s500_s26  ;;  %s503_s29 = int_to_ptr.hbm [resolvable:$true] %s502_s29 }
 0x307   : > { %606 = dma.vmem_to_hbm [thread:$0]  (%p620_p9), %s501_s26, 128, %s503_s29, [#allocation6]  }
 0x308   : > { %747 = dma.done.wait (%p620_p9), [#allocation6], 128  }
 0x309   : > { %749 = vsyncadd (%p620_p9), [#allocation6], 4294967168 }
 0x30a PF: > { %s19_s21 = sadd.s32 1, %s752_s21  }
 0x30b   : > { %p16_p10 = scmp.ge.s32.totalorder %s19_s21, 4  }
 0x30d   :  { %18 = sbr.rel (!%p16_p10) target bundleno = 3 (0x3), region = 91 }
 0x312   :  { %516 = vsyncpa [#allocation5], 1 }
 0x313   :  { %518 = vsyncpa [#allocation5 + $0x1], 1 }
 0x314   :  { %519 = vsyncpa [#allocation8], 1 }
 0x315   :  { %520 = vsyncpa [#allocation6], 1 }
 0x316   :  { %522 = vsyncpa [#allocation6 + $0x1], 1 }

</bundles_post_ra>
